<compile_context>
chip_gen: v7x
topology: tpu7x:2x2x1
jax: 0.10.0
libtpu: 0.0.40
codegen_flags: <defaults>
</compile_context>

<pallas_src>
import jax
import jax.numpy as jnp
from jax.experimental import pallas as pl
from jax.experimental.pallas import tpu as pltpu


def _tsadd_kernel(x_ref, o_ref):
    """x_ref: (b_tile, F, t_tile) strided samples; o_ref: (b_tile, P, t_tile)."""
    F = x_ref.shape[1]
    od = o_ref.dtype
    off = 0
    # Row-major pair order: for each i, pairs (i, i+1)..(i, F-1) form one
    # contiguous slab of the output.  Per-slab stores avoid materializing a
    # second full (b, P, t) tile (no concatenate) and a full f32 input copy.
    for i in range(F - 1):
        n = F - 1 - i
        lhs = x_ref[:, i:i + 1, :].astype(od)     # (b, 1, t)
        rhs = x_ref[:, i + 1:, :].astype(od)      # (b, n, t)
        o_ref[:, off:off + n, :] = lhs + rhs
        off += n


def _vmem_capacity_bytes():
    try:
        return int(pltpu.get_tpu_info().vmem_capacity_bytes)
    except Exception:
        return 64 * 1024 * 1024   # conservative fallback (v7x per-core VMEM)


def _choose_tiles(B, F, P, T, in_itemsize, out_itemsize, vmem_cap):
    # Per-(batch, time) VMEM cost: double-buffered in/out blocks plus the
    # in-kernel temporaries (per-slab casts and sums).
    per_bt = (2 * F * in_itemsize + 2 * P * out_itemsize
              + F * in_itemsize + 3 * max(F - 1, 1) * out_itemsize)
    budget = vmem_cap // 4                 # ~16 MiB on v7x, ~32 MiB on v5e/v6e
    target_out_bytes = 4 * 1024 * 1024     # aim for ~1-4 MiB of output / step

    # Time tile: the whole extent if it fits, else the largest 128-multiple
    # that does.  Never exceeds T (no block padded past the array extent).
    t_cap = max(budget // per_bt, 128)
    if T <= t_cap:
        t_tile = T
    else:
        t_tile = (t_cap // 128) * 128

    # Batch tile: enough batches per step to write ~target_out_bytes, bounded
    # by the VMEM budget and by B.
    out_bytes_per_b = max(P * t_tile * out_itemsize, 1)
    b_target = max(target_out_bytes // out_bytes_per_b, 1)
    b_vmem = max(budget // (per_bt * t_tile), 1)
    b_tile = int(min(B, b_target, b_vmem))

    # Guarantee >= 2 grid steps when possible so both v7x TensorCores get work
    # (no effect on single-core v5e/v6e beyond a negligible extra step).
    if pl.cdiv(B, b_tile) * pl.cdiv(T, t_tile) < 2:
        if B >= 2:
            b_tile = (B + 1) // 2
        elif T > 128:
            half = ((-(-T // 2) + 127) // 128) * 128
            if half < T:
                t_tile = half
    return b_tile, t_tile


def ts_add(x, min_, stride, *, out_dtype=None, b_tile=None, t_tile=None):
    """Pallas implementation of TsAdd.forward.

    x: (B, F, S).  Returns (B, F*(F-1)//2, (S - min_)//stride + 1) in
    `out_dtype` (default float32, matching torch.zeros in the reference;
    pass x.dtype to halve the dominant HBM write stream when acceptable).
    """
    # TODO(synk): min > 1 has no shape-valid semantics in the PyTorch module
    # (`output[:, k, t] = <length-min vector>`), so only min == 1 is supported.
    assert min_ == 1, "TsAdd reference semantics require min == 1"
    B, F, S = x.shape
    assert F >= 2, "need at least two features to form pairs"
    T = (S - min_) // stride + 1
    P = F * (F - 1) // 2
    out_dtype = jnp.float32 if out_dtype is None else jnp.dtype(out_dtype)

    # Strided time subsampling (window length = min = 1).  allow_input_fusion
    # below allows XLA to fuse this slice into the pallas call's input stream
    # instead of materializing the subsampled array through HBM first.
    if stride == 1:
        xs = x if T == S else x[:, :, :T]
    else:
        xs = jax.lax.slice(x, (0, 0, 0), (B, F, (T - 1) * stride + 1),
                           (1, 1, stride))

    vmem_cap = _vmem_capacity_bytes()
    in_sz = jnp.dtype(xs.dtype).itemsize
    out_sz = jnp.dtype(out_dtype).itemsize
    bt, tt = _choose_tiles(B, F, P, T, in_sz, out_sz, vmem_cap)
    if b_tile is None:
        b_tile = bt
    if t_tile is None:
        t_tile = tt

    grid = (pl.cdiv(B, b_tile), pl.cdiv(T, t_tile))

    return pl.pallas_call(
        _tsadd_kernel,
        out_shape=jax.ShapeDtypeStruct((B, P, T), out_dtype),
        grid_spec=pltpu.PrefetchScalarGridSpec(
            num_scalar_prefetch=0,
            grid=grid,
            in_specs=[pl.BlockSpec((b_tile, F, t_tile), lambda b, t: (b, 0, t))],
            out_specs=pl.BlockSpec((b_tile, P, t_tile), lambda b, t: (b, 0, t)),
        ),
        compiler_params=pltpu.CompilerParams(
            dimension_semantics=("parallel", "parallel"),
            allow_input_fusion=[True],
            vmem_limit_bytes=min(vmem_cap * 5 // 8, 96 * 1024 * 1024),
        ),
    )(xs)


if __name__ == "__main__":
    key = jax.random.PRNGKey(0)
    B, F, S = 2, 4, 16          # batch, num_features, seq_length
    min_, stride = 1, 2
    x = jax.random.normal(key, (B, F, S), dtype=jnp.float32)

    out = jax.block_until_ready(ts_add(x, min_, stride))

    # Plain-JAX reference of the same semantics.
    T = (S - min_) // stride + 1
    xs = x[:, :, ::stride][:, :, :T]
    ref = jnp.stack(
        [xs[:, i, :] + xs[:, j, :] for i in range(F) for j in range(i + 1, F)],
        axis=1,
    ).astype(jnp.float32)
    assert out.shape == (B, F * (F - 1) // 2, T)
    assert jnp.allclose(out, ref, atol=1e-6)

    print("KERNEL_OK")
</pallas_src>

<mosaic_0001>
module attributes {stable_mosaic.version = 11 : i64} {
  func.func @_tsadd_kernel(%arg0: i32, %arg1: i32, %arg2: memref<1x4x8xf32, #tpu.memory_space<vmem>>, %arg3: memref<1x6x8xf32, #tpu.memory_space<vmem>>) attributes {dimension_semantics = [#tpu.dimension_semantics<parallel>, #tpu.dimension_semantics<parallel>], iteration_bounds = array<i64: 2, 1>, scalar_prefetch = 0 : i64, scratch_operands = 0 : i64, tpu.core_type = #tpu.core_type<tc>, window_params = [{transform_indices = @transform_0, window_bounds = array<i64: 1, 4, 8>}, {transform_indices = @transform_1, window_bounds = array<i64: 1, 6, 8>}]} {
    %c0 = arith.constant 0 : index
    %c0_0 = arith.constant 0 : index
    %c0_1 = arith.constant 0 : index
    %0 = vector.load %arg2[%c0, %c0_0, %c0_1] : memref<1x4x8xf32, #tpu.memory_space<vmem>>, vector<1x1x8xf32>
    %c0_2 = arith.constant 0 : index
    %c1 = arith.constant 1 : index
    %c0_3 = arith.constant 0 : index
    %1 = vector.load %arg2[%c0_2, %c1, %c0_3] : memref<1x4x8xf32, #tpu.memory_space<vmem>>, vector<1x3x8xf32>
    %2 = vector.broadcast %0 : vector<1x1x8xf32> to vector<1x3x8xf32>
    %3 = arith.addf %2, %1 : vector<1x3x8xf32>
    %c0_4 = arith.constant 0 : index
    %c0_5 = arith.constant 0 : index
    %c0_6 = arith.constant 0 : index
    %4 = vector.load %arg3[%c0_4, %c0_5, %c0_6] : memref<1x6x8xf32, #tpu.memory_space<vmem>>, vector<1x3x8xf32>
    tpu.vector_store %arg3[%c0_4, %c0_5, %c0_6], %3 {strides = array<i32>} : memref<1x6x8xf32, #tpu.memory_space<vmem>>, vector<1x3x8xf32>,
    %c0_7 = arith.constant 0 : index
    %c1_8 = arith.constant 1 : index
    %c0_9 = arith.constant 0 : index
    %5 = vector.load %arg2[%c0_7, %c1_8, %c0_9] : memref<1x4x8xf32, #tpu.memory_space<vmem>>, vector<1x1x8xf32>
    %c0_10 = arith.constant 0 : index
    %c2 = arith.constant 2 : index
    %c0_11 = arith.constant 0 : index
    %6 = vector.load %arg2[%c0_10, %c2, %c0_11] : memref<1x4x8xf32, #tpu.memory_space<vmem>>, vector<1x2x8xf32>
    %7 = vector.broadcast %5 : vector<1x1x8xf32> to vector<1x2x8xf32>
    %8 = arith.addf %7, %6 : vector<1x2x8xf32>
    %c0_12 = arith.constant 0 : index
    %c3 = arith.constant 3 : index
    %c0_13 = arith.constant 0 : index
    %9 = vector.load %arg3[%c0_12, %c3, %c0_13] : memref<1x6x8xf32, #tpu.memory_space<vmem>>, vector<1x2x8xf32>
    tpu.vector_store %arg3[%c0_12, %c3, %c0_13], %8 {strides = array<i32>} : memref<1x6x8xf32, #tpu.memory_space<vmem>>, vector<1x2x8xf32>,
    %c0_14 = arith.constant 0 : index
    %c2_15 = arith.constant 2 : index
    %c0_16 = arith.constant 0 : index
    %10 = vector.load %arg2[%c0_14, %c2_15, %c0_16] : memref<1x4x8xf32, #tpu.memory_space<vmem>>, vector<1x1x8xf32>
    %c0_17 = arith.constant 0 : index
    %c3_18 = arith.constant 3 : index
    %c0_19 = arith.constant 0 : index
    %11 = vector.load %arg2[%c0_17, %c3_18, %c0_19] : memref<1x4x8xf32, #tpu.memory_space<vmem>>, vector<1x1x8xf32>
    %12 = arith.addf %10, %11 : vector<1x1x8xf32>
    %c0_20 = arith.constant 0 : index
    %c5 = arith.constant 5 : index
    %c0_21 = arith.constant 0 : index
    %13 = vector.load %arg3[%c0_20, %c5, %c0_21] : memref<1x6x8xf32, #tpu.memory_space<vmem>>, vector<1x1x8xf32>
    tpu.vector_store %arg3[%c0_20, %c5, %c0_21], %12 {strides = array<i32>} : memref<1x6x8xf32, #tpu.memory_space<vmem>>, vector<1x1x8xf32>,
    return
  }
  func.func @transform_0(%arg0: i32, %arg1: i32) -> (i32, i32, i32) {
    %c0_i32 = arith.constant 0 : i32
    %c0_i32_0 = arith.constant 0 : i32
    return %arg0, %c0_i32, %arg1 : i32, i32, i32
  }
  func.func @transform_1(%arg0: i32, %arg1: i32) -> (i32, i32, i32) {
    %c0_i32 = arith.constant 0 : i32
    %c0_i32_0 = arith.constant 0 : i32
    return %arg0, %c0_i32, %arg1 : i32, i32, i32
  }
}

</mosaic_0001>

<bundles_post_ra>
// kernel: tpu_custom_call.1
= control target key start
LH: loop header
LB: loop body
LE: loop exit
PB: predicated region body
PF: predicated region fallthrough
CT: control target
= control target key end

     0   :  { %6 = vsyncpa [#allocation3], 0  ;;  %s548_s0 = inlined_call_operand.hbm [shape: f32[2,4,8], index: 0, kind: input, shape index: {}]   ;;  %s549_s1 = inlined_call_operand.vmem [shape: f32[2,6,8], index: 1, kind: output, shape index: {}]  }
   0x1   :  { %8 = vsyncpa [#allocation3 + $0x1], 0  ;;  %s423_s6 = smov 0   ;;  %s425_s7 = smov 0  }
   0x2   :  { %s427_s8 = smov 0   ;;  %s429_s9 = smov 0  }
   0x3   :  { %s431_s10 = smov 0   ;;  %s433_s11 = smov 0  }
   0x4 LB: > { %s262_s12 = sadd.s32 4294967295, %s410_s11   ;;  %s26_s13 = sadd.s32 1, %s406_s10  ;;  %s410_s11 = sphi %s433_s11, %s14_s11   ;;  %s406_s10 = sphi %s431_s10, %s559_s10   ;;  %s402_s9 = sphi %s429_s9, %s558_s9   ;;  %s398_s8 = sphi %s427_s8, %s557_s8   ;;  %s394_s7 = sphi %s425_s7, %s556_s7   ;;  %s390_s6 = sphi %s423_s6, %s555_s6  }
   0x5   : > { %p28_p0 = scmp.ge.s32.totalorder %s26_s13, 2  ;;  %s35_s14 = sadd.s32 1, %s398_s8 }
   0x6   : > { %p42_p1 = scmp.ne.s32.totalorder %s398_s8, %s394_s7  ;;  %p43_p2 = scmp.eq.s32.totalorder %s410_s11, 0 }
   0x7   : > { %s561_s13 = smov (%p28_p0, %s26_s13), 0  ;;  %p48_p4 = scmp.ne.s32.totalorder %s394_s7, %s390_s6 }
   0x8   : > { %p459_p3 = por %p43_p2, %p42_p1  ;;  %s30_s16 = ssub.s32 %s406_s10, %s561_s13 }
   0x9   : > { %p49_p5 = scmp.eq.s32.totalorder %s262_s12, 0  ;;  %p33_p6 = scmp.eq.s32.totalorder %s30_s16, 0 }
   0xa   : > { %p281_p8 = scmp.lt.s32.totalorder %s410_s11, 2  ;;  %s100_s19 = sand.u32 1, %s398_s8  }
   0xb   : > { %p466_p7 = por %p49_p5, %p48_p4  ;;  %s267_s20 = sshll.u32 %s406_s10, 6 }
   0xc   : > { %s472_s18 = scalar_select %p33_p6, %s398_s8, %s35_s14  }
   0xd   : > { %s266_s21 = sshll.u32 %s100_s19, 2  ;;  %s479_s24 = scalar_lea.hbm %s548_s0, %s267_s20 }
   0xe   : > { %s104_s25 = scalar_lea.vmem [#allocation2], %s266_s21  ;;  %p483_p9 = pnand %p281_p8, %p459_p3 }
   0xf   : > { %s112_s26 = sshll.u32 %s104_s25, 4  ;;  %s101_s28 = scalar_lea.sflag [#allocation3], %s100_s19  ;;  %s487_s26 = int_to_ptr.vmem [resolvable:$true] %s112_s26 }
  0x10   : > { %s330_s29 = scalar_lea.hbm %s479_s24, 64  ;;  %p332_p13 = pneg %p483_p9 }
  0x11   : > { %p331_p12 = scmp.ne.s32.totalorder %s479_s24, %s330_s29  ;;  %s335_s3 = scalar_lea.hbm %s548_s0, 128 }
  0x12   : > { %p336_p2 = scmp.lt.u32.totalorder %s479_s24, %s548_s0  ;;  %p337_p3 = scmp.lt.u32.totalorder %s335_s3, %s330_s29 }
  0x13   : > { %p333_p0 = pnand %p332_p13, %p331_p12  ;;  %p339_p5 = scmp.lt.u32.totalorder %s330_s29, %s479_s24 }
  0x14   : > { %p338_p4 = por %p337_p3, %p336_p2 }
  0x15   : > { %p334_p1 = pneg %p333_p0 }
  0x16   : > { %p340_p6 = por %p339_p5, %p338_p4 }
  0x18   : > { %p341_p8 = pnand %p340_p6, %p334_p1 }
  0x1a   : > { %344 = shalt.err (!%p341_p8)
}
  0x1b   : > { %s345_s6 = scalar_lea.vmem %s487_s26, 64  ;;  %s412_s12 = smov [#allocation2]  }
  0x1c   : > { %p346_p12 = scmp.ne.s32.totalorder %s487_s26, %s345_s6  ;;  %s350_s14 = sshll.u32 %s412_s12, 4  ;;  %s351_s14 = int_to_ptr.vmem [resolvable:$false] %s350_s14 }
  0x1d   : > { %s352_s15 = scalar_lea.vmem %s351_s14, 128  ;;  %p353_p11 = scmp.lt.s32.totalorder %s487_s26, %s351_s14 }
  0x1e   : > { %p348_p0 = pnand %p346_p12, %p332_p13  ;;  %p354_p2 = scmp.lt.s32.totalorder %s352_s15, %s345_s6 }
  0x20   : > { %p349_p10 = pneg %p348_p0  ;;  %p355_p3 = por %p354_p2, %p353_p11 }
  0x22   : > { %p356_p4 = pnand %p355_p3, %p349_p10 }
  0x24   : > { %359 = shalt.err (!%p356_p4)
}
  0x25   : > { %280 = dma.hbm_to_vmem [thread:$0]  (!%p483_p9), %s479_s24, 64, %s487_s26, %s101_s28  }
  0x26   : > { %p553_p1 = scmp.lt.s32.totalorder %s410_s11, 3  ;;  %p554_p5 = scmp.ge.s32.totalorder %s410_s11, 1 }
  0x28   : > { %p118_p13 = pnand %p554_p5, %p553_p1 }
  0x29   : > { %s123_s16 = sand.u32 (!%p118_p13), 1, %s394_s7  }
  0x2a   : > { %121 = sbr.rel (%p118_p13) target bundleno = 58 (0x3a), region = 24  ;;  %s269_s19 = sshll.u32 (!%p118_p13), %s123_s16, 2 }
  0x2b   : > { %s124_s20 = scalar_lea.sflag (!%p118_p13), [#allocation3], %s123_s16  ;;  %s127_s21 = scalar_lea.vmem (!%p118_p13), [#allocation2], %s269_s19 }
  0x31   : > { %385 = dma.done.wait (%p466_p7), %s124_s20, 64  }
  0x32   : > { %387 = vsyncadd (%p466_p7), %s124_s20, 4294967232  ;;  %p148_p10 = scmp.lt.s32.totalorder %s402_s9, 1  ;;  %vm162_vm0 = vcmask 59392   ;;  %vm171_vm1 = vcmask 58368   ;;  %vm176_vm2 = vcmask 57344  }
  0x33   : > { %v271_v0 = vld [vmem:[%s127_s21] ss:$0 sm:$0xff]  ;;  %v156_v1 = vld [vmem:[%s127_s21 + $0x1] sm:$0x7] }
  0x34   : > { %s563_s9 = smov (!%p148_p10, %s402_s9), 1  ;;  %v272_v2 = vld [vmem:[%s127_s21 + $0x1] ss:$0 sm:$0xff]  ;;  %v161_v3 = vadd.f32 %v271_v0, %v156_v1  ;;  %v165_v4 = vld [vmem:[%s127_s21 + $0x2] sm:$0x3] }
  0x35   : > { %s270_s22 = sshll.u32 %s563_s9, 3  ;;  %v173_v5 = vld [vmem:[%s127_s21 + $0x2] sm:$0x1]  ;;  %v174_v6 = vld [vmem:[%s127_s21 + $0x3] sm:$0x1]  ;;  %v170_v7 = vadd.f32 %v272_v2, %v165_v4 }
  0x36   : > { %s154_s25 = scalar_lea.vmem %s549_s1, %s270_s22  ;;  %v175_v8 = vadd.f32 %v174_v6, %v173_v5 }
  0x37   : > { %163 = vst.msk [vmem:[%s154_s25] sm:$0x7] %vm162_vm0, %v161_v3 }
  0x38   : > { %172 = vst.msk [vmem:[%s154_s25 + $0x3] sm:$0x3] %vm171_vm1, %v170_v7 }
  0x39   : > { %177 = vst.msk [vmem:[%s154_s25 + $0x5] sm:$0x1] %vm176_vm2, %v175_v8 }
  0x3a PF: > { %s14_s11 = sadd.s32 1, %s410_s11   ;;  %s555_s6 = smov %s394_s7 }
  0x3b   : > { %p11_p7 = scmp.ge.s32.totalorder %s14_s11, 4   ;;  %s556_s7 = smov %s398_s8 }
  0x3c   : > { %s557_s8 = smov %s472_s18  ;;  %s558_s9 = smov %s406_s10 }
  0x3d   : > { %s559_s10 = smov %s561_s13  ;;  %13 = sbr.rel (!%p11_p7) target bundleno = 4 (0x4), region = 64 }
  0x44   :  { %203 = vsyncpa [#allocation3], 1 }
  0x45   :  { %205 = vsyncpa [#allocation3 + $0x1], 1 }

</bundles_post_ra>
